<compile_context>
chip_gen: v7x
topology: tpu7x:2x2x1
jax: 0.10.0
libtpu: 0.0.40
codegen_flags: <defaults>
</compile_context>

<pallas_src>
import math
import functools

import jax
import jax.numpy as jnp
from jax import lax
from jax.experimental import pallas as pl
from jax.experimental.pallas import tpu as pltpu


def _round_up(x, m):
    return ((x + m - 1) // m) * m


def _cdiv(a, b):
    return (a + b - 1) // b


# ---------------------------------------------------------------------------
# Kernels
# ---------------------------------------------------------------------------
def _logreg_kernel_single(x_ref, w_ref, b_ref, o_ref):
    # Single K step: o = x @ w + b, no scratch, no pl.when.
    # x_ref: (tm, K)   w_ref: (K, C_pad)  b_ref: (1, C_pad)  o_ref: (tm, C_pad)
    o_ref[...] = (
        jnp.dot(x_ref[...], w_ref[...], preferred_element_type=jnp.float32)
        + b_ref[...]
    ).astype(o_ref.dtype)


def _logreg_kernel_multi(x_ref, w_ref, b_ref, o_ref, acc_ref, *, tk, k_rem,
                         w_resident):
    # x_ref: (tm, tk) activation tile (last K tile may be partial -> masked)
    # w_ref: (K_w, C_pad) resident weight  OR  (tk, C_pad) streamed tile
    # b_ref: (1, C_pad) bias; o_ref: (tm, C_pad); acc_ref: (tm, C_pad) f32
    k = pl.program_id(1)
    nk = pl.num_programs(1)

    @pl.when(k == 0)
    def _():
        acc_ref[...] = jnp.zeros_like(acc_ref)

    x = x_ref[...]
    if k_rem:
        # The last K tile extends past the true feature dim; its out-of-bounds
        # columns hold undefined data, so zero them before feeding the MXU.
        col = lax.broadcasted_iota(jnp.int32, x.shape, 1)
        limit = jnp.where(k == nk - 1, k_rem, tk)
        x = jnp.where(col < limit, x, jnp.zeros_like(x))

    if w_resident:
        start = pl.multiple_of(k * tk, tk)
        w = w_ref[pl.ds(start, tk), :]
    else:
        w = w_ref[...]

    acc_ref[...] += jnp.dot(x, w, preferred_element_type=jnp.float32)

    @pl.when(k == nk - 1)
    def _():
        o_ref[...] = (acc_ref[...] + b_ref[...]).astype(o_ref.dtype)


# ---------------------------------------------------------------------------
# Wrapper
# ---------------------------------------------------------------------------
@functools.partial(jax.jit,
                   static_argnames=("row_tile", "k_tile", "compute_dtype"))
def logreg_forward(seq, weight, bias, *, row_tile=512, k_tile=1024,
                   compute_dtype=None):
    """nn.Linear forward: seq @ weight.T + bias.

    seq: [N, ft_in]; weight: [nb_classes, ft_in] (PyTorch layout); bias: [nb_classes].
    compute_dtype: optional MXU operand dtype (e.g. jnp.bfloat16); accumulation,
    bias add and the output stay in f32 / seq.dtype.
    """
    N, K = seq.shape
    C = weight.shape[0]
    out_dtype = seq.dtype
    o_isz = jnp.dtype(out_dtype).itemsize

    x = seq if compute_dtype is None else seq.astype(compute_dtype)
    w = weight if compute_dtype is None else weight.astype(compute_dtype)
    x_isz = jnp.dtype(x.dtype).itemsize

    # Lane-dense class dim: pad only the tiny operands (weight/bias) to 128.
    C_pad = _round_up(C, 128)

    # Row tile: large and sublane-aligned, but capped near N/2 so the parallel
    # row axis has >=2 blocks (keeps both v7x TensorCores busy). The possibly
    # partial last row block is handled by the grid -- no activation padding.
    tm = min(row_tile, max(8, _round_up(_cdiv(N, 2), 8)))
    n_i = _cdiv(N, tm)

    b_p = jnp.pad(bias.astype(jnp.float32).reshape(1, C),
                  ((0, 0), (0, C_pad - C)))

    if K <= k_tile:
        # ---- single K step: resident weight, no accumulator scratch --------
        w_p = jnp.pad(w.T, ((0, 0), (0, C_pad - C)))          # [K, C_pad]
        grid = (n_i,)
        kernel = _logreg_kernel_single
        in_specs = [
            pl.BlockSpec((tm, K), lambda i: (i, 0)),           # activations
            pl.BlockSpec((K, C_pad), lambda i: (0, 0)),        # resident weight
            pl.BlockSpec((1, C_pad), lambda i: (0, 0)),        # resident bias
        ]
        out_spec = pl.BlockSpec((tm, C_pad), lambda i: (i, 0))
        scratch = []
        dim_sem = ("parallel",)
        vmem_needed = (2 * tm * K * x_isz
                       + K * C_pad * x_isz
                       + 2 * tm * C_pad * o_isz
                       + C_pad * 4)
    else:
        # ---- tiled reduction axis with f32 accumulator ----------------------
        tk = k_tile
        n_k = _cdiv(K, tk)
        k_rem = K % tk
        K_w = n_k * tk
        # Weight is tiny: transpose + zero-pad it once so every K slice is
        # in-bounds, and keep it fully VMEM-resident when it fits.
        w_p = jnp.pad(w.T, ((0, K_w - K), (0, C_pad - C)))     # [K_w, C_pad]
        w_resident = (K_w * C_pad * x_isz) <= (12 << 20)
        grid = (n_i, n_k)
        kernel = functools.partial(_logreg_kernel_multi, tk=tk, k_rem=k_rem,
                                   w_resident=w_resident)
        if w_resident:
            w_spec = pl.BlockSpec((K_w, C_pad), lambda i, k: (0, 0))
        else:
            w_spec = pl.BlockSpec((tk, C_pad), lambda i, k: (k, 0))
        in_specs = [
            pl.BlockSpec((tm, tk), lambda i, k: (i, k)),       # activations
            w_spec,
            pl.BlockSpec((1, C_pad), lambda i, k: (0, 0)),     # resident bias
        ]
        out_spec = pl.BlockSpec((tm, C_pad), lambda i, k: (i, 0))
        scratch = [pltpu.VMEM((tm, C_pad), jnp.float32)]
        dim_sem = ("parallel", "arbitrary")
        vmem_needed = (2 * tm * tk * x_isz
                       + (K_w * C_pad * x_isz if w_resident
                          else 2 * tk * C_pad * x_isz)
                       + 2 * tm * C_pad * o_isz
                       + tm * C_pad * 4
                       + C_pad * 4)

    vmem_limit = min(max(int(vmem_needed * 1.5) + (4 << 20), 16 << 20),
                     100 << 20)

    cost = pl.CostEstimate(
        flops=2 * N * K * C_pad,
        transcendentals=0,
        bytes_accessed=int(x.size * x_isz + w_p.size * x_isz
                           + b_p.size * 4 + N * C_pad * o_isz),
    )

    out = pl.pallas_call(
        kernel,
        out_shape=jax.ShapeDtypeStruct((N, C_pad), out_dtype),
        grid_spec=pltpu.PrefetchScalarGridSpec(
            num_scalar_prefetch=0,
            grid=grid,
            in_specs=in_specs,
            out_specs=out_spec,
            scratch_shapes=scratch,
        ),
        compiler_params=pltpu.CompilerParams(
            dimension_semantics=dim_sem,
            vmem_limit_bytes=vmem_limit,
        ),
        cost_estimate=cost,
    )(x, w_p, b_p)

    return out[:, :C]


def xavier_uniform(key, shape, dtype=jnp.float32):
    # Matches torch.nn.init.xavier_uniform_ for a Linear weight [out, in].
    fan_out, fan_in = shape
    bound = math.sqrt(6.0 / (fan_in + fan_out))
    return jax.random.uniform(key, shape, dtype=dtype, minval=-bound, maxval=bound)


if __name__ == "__main__":
    key = jax.random.PRNGKey(0)
    k_x, k_w = jax.random.split(key)

    # Small shapes consistent with LogReg(ft_in, nb_classes).
    N, ft_in, nb_classes = 16, 32, 8
    seq = jax.random.normal(k_x, (N, ft_in), dtype=jnp.float32)
    weight = xavier_uniform(k_w, (nb_classes, ft_in))   # PyTorch Linear layout
    bias = jnp.zeros((nb_classes,), dtype=jnp.float32)  # bias.data.fill_(0.0)

    out = jax.block_until_ready(logreg_forward(seq, weight, bias))
    ref = seq @ weight.T + bias
    assert out.shape == (N, nb_classes)
    assert jnp.allclose(out, ref, atol=1e-5, rtol=1e-5)

    # Non-divisible N and K <= k_tile (single-K fast path, partial row block).
    N2, K2, C2 = 300, 1000, 6
    k1, k2 = jax.random.split(k_x)
    seq2 = jax.random.normal(k1, (N2, K2), dtype=jnp.float32)
    w2 = xavier_uniform(k2, (C2, K2))
    b2 = jnp.zeros((C2,), dtype=jnp.float32)
    out2 = jax.block_until_ready(logreg_forward(seq2, w2, b2))
    ref2 = seq2 @ w2.T + b2
    assert out2.shape == (N2, C2)
    assert jnp.allclose(out2, ref2, atol=1e-4, rtol=1e-4)

    # K > k_tile path: resident weight, in-kernel K-tail mask, f32 accumulator.
    N3, K3, C3 = 300, 3000, 6
    k3, k4 = jax.random.split(k1)
    seq3 = jax.random.normal(k3, (N3, K3), dtype=jnp.float32)
    w3 = xavier_uniform(k4, (C3, K3))
    b3 = jnp.zeros((C3,), dtype=jnp.float32)
    out3 = jax.block_until_ready(logreg_forward(seq3, w3, b3))
    ref3 = seq3 @ w3.T + b3
    assert out3.shape == (N3, C3)
    assert jnp.allclose(out3, ref3, atol=1e-4, rtol=1e-4)

    # bf16 operand streaming (f32 accumulation) — looser tolerance.
    out3_bf16 = jax.block_until_ready(
        logreg_forward(seq3, w3, b3, compute_dtype=jnp.bfloat16))
    assert out3_bf16.shape == (N3, C3)
    assert jnp.allclose(out3_bf16, ref3, atol=5e-2, rtol=5e-2)

    print("KERNEL_OK")
</pallas_src>

<mosaic_0001>
module attributes {stable_mosaic.version = 11 : i64} {
  func.func @_logreg_kernel_single(%arg0: i32, %arg1: memref<8x32xf32, #tpu.memory_space<vmem>>, %arg2: memref<32x128xf32, #tpu.memory_space<vmem>>, %arg3: memref<1x128xf32, #tpu.memory_space<vmem>>, %arg4: memref<8x128xf32, #tpu.memory_space<vmem>>) attributes {dimension_semantics = [#tpu.dimension_semantics<parallel>], iteration_bounds = array<i64: 2>, scalar_prefetch = 0 : i64, scratch_operands = 0 : i64, tpu.core_type = #tpu.core_type<tc>, window_params = [{transform_indices = @transform_0, window_bounds = array<i64: 8, 32>}, {pipeline_mode = #tpu.pipeline_mode<synchronous>, transform_indices = @transform_1, window_bounds = array<i64: 32, 128>}, {pipeline_mode = #tpu.pipeline_mode<synchronous>, transform_indices = @transform_2, window_bounds = array<i64: 1, 128>}, {transform_indices = @transform_3, window_bounds = array<i64: 8, 128>}]} {
    %c0 = arith.constant 0 : index
    %c0_0 = arith.constant 0 : index
    %0 = vector.load %arg1[%c0, %c0_0] : memref<8x32xf32, #tpu.memory_space<vmem>>, vector<8x32xf32>
    %c0_1 = arith.constant 0 : index
    %c0_2 = arith.constant 0 : index
    %1 = vector.load %arg2[%c0_1, %c0_2] : memref<32x128xf32, #tpu.memory_space<vmem>>, vector<32x128xf32>
    %cst = arith.constant dense<0.000000e+00> : vector<8x128xf32>
    %2 = tpu.matmul %0, %1, %cst {dimension_numbers = #tpu.dot_dimension_numbers<[1], [0], [0], [1], [0, 0, 1, 1], [], []>} : vector<8x32xf32>, vector<32x128xf32>, vector<8x128xf32> -> vector<8x128xf32>
    %c0_3 = arith.constant 0 : index
    %c0_4 = arith.constant 0 : index
    %3 = vector.load %arg3[%c0_3, %c0_4] : memref<1x128xf32, #tpu.memory_space<vmem>>, vector<1x128xf32>
    %4 = vector.broadcast %3 : vector<1x128xf32> to vector<8x128xf32>
    %5 = arith.addf %2, %4 : vector<8x128xf32>
    %c0_5 = arith.constant 0 : index
    %c0_6 = arith.constant 0 : index
    %6 = vector.load %arg4[%c0_5, %c0_6] : memref<8x128xf32, #tpu.memory_space<vmem>>, vector<8x128xf32>
    tpu.vector_store %arg4[%c0_5, %c0_6], %5 {strides = array<i32>} : memref<8x128xf32, #tpu.memory_space<vmem>>, vector<8x128xf32>,
    return
  }
  func.func @transform_0(%arg0: i32) -> (i32, i32) {
    %c0_i32 = arith.constant 0 : i32
    %c0_i32_0 = arith.constant 0 : i32
    return %arg0, %c0_i32 : i32, i32
  }
  func.func @transform_1(%arg0: i32) -> (i32, i32) {
    %c0_i32 = arith.constant 0 : i32
    %c0_i32_0 = arith.constant 0 : i32
    %c0_i32_1 = arith.constant 0 : i32
    return %c0_i32, %c0_i32_0 : i32, i32
  }
  func.func @transform_2(%arg0: i32) -> (i32, i32) {
    %c0_i32 = arith.constant 0 : i32
    %c0_i32_0 = arith.constant 0 : i32
    %c0_i32_1 = arith.constant 0 : i32
    return %c0_i32, %c0_i32_0 : i32, i32
  }
  func.func @transform_3(%arg0: i32) -> (i32, i32) {
    %c0_i32 = arith.constant 0 : i32
    %c0_i32_0 = arith.constant 0 : i32
    return %arg0, %c0_i32 : i32, i32
  }
}

</mosaic_0001>

<bundles_post_ra>
// kernel: logreg_forward.1
= control target key start
LH: loop header
LB: loop body
LE: loop exit
PB: predicated region body
PF: predicated region fallthrough
CT: control target
= control target key end

     0   :  { %s381_s12 = smov 0   ;;  %s413_s0 = inlined_call_operand.vmem [shape: f32[16,32], index: 0, kind: input, shape index: {}]   ;;  %s414_s1 = inlined_call_operand.vmem [shape: f32[32,128], index: 1, kind: input, shape index: {}]   ;;  %s415_s2 = inlined_call_operand.vmem [shape: f32[1,128], index: 2, kind: input, shape index: {}]   ;;  %s416_s3 = inlined_call_operand.vmem [shape: f32[16,128], index: 3, kind: output, shape index: {}]  }
   0x1 LB: > { %s306_s13 = sadd.s32 4294967295, %s356_s12   ;;  %p310_p0 = scmp.ge.s32.totalorder %s356_s12, 1  ;;  %s356_s12 = sphi %s381_s12, %s13_s12  }
   0x2   : > { %p136_p1 = scmp.lt.s32.totalorder %s356_s12, 3 }
   0x4   : > { %p137_p2 = pnand %p310_p0, %p136_p1 }
   0x5   : > { %v167_v0 = vld [vmem:[%s414_s1] sm:$0xff] (!%p137_p2)  ;;  %v168_v1 = vld [vmem:[%s414_s1 + $0x8] sm:$0xff] (!%p137_p2)  ;;  %v169_v2 = vld [vmem:[%s414_s1 + $0x10] sm:$0xff] (!%p137_p2)  ;;  %v358_v3 = vmov (!%p137_p2), 0.0|0.0   ;;  %vm359_vm0 = vmmov (!%p137_p2), 0   ;;  %v360_v6 = vmov (!%p137_p2), 0.0  }
   0x6   : > { %140 = sbr.rel (%p137_p2) target bundleno = 232 (0xe8), region = 32  ;;  %333 = vmatprep.subr.bf16.mxu0 (!%p137_p2), %v358_v3  ;;  %v334_v4 = vpack.c.bf16 (!%p137_p2), %v168_v1, %v167_v0  ;;  %v170_v5 = vld [vmem:[%s414_s1 + $0x18] sm:$0xff] (!%p137_p2)  ;;  %330 = vmatprep.mubr.msk.f32.mxu0 (!%p137_p2), %vm359_vm0, %v360_v6  ;;  %p158_p3 = scmp.lt.s32.totalorder (!%p137_p2), %s306_s13, 1  ;;  %vm178_vm1 = vcmask (!%p137_p2), 261120   ;;  %v313_v9 = vld [vmem:[%s415_s2] ss:$0 sm:$0xff] (!%p137_p2) }
   0x7   : > { %v337_v7 = vpack.c.bf16 (!%p137_p2), %v170_v5, %v169_v2 }
   0x8   : > { %335 = vmatpush3.bf16.msra.mxu0 (!%p137_p2), %v334_v4 }
   0x9   : > { %336 = vmatprep.subr.bf16.mxu0 (!%p137_p2), %v358_v3 }
   0xc   : > { %338 = vmatpush3.bf16.msra.mxu0 (!%p137_p2), %v337_v7 }
   0xd   : > { %s418_s13 = smov (!%p158_p3, %s306_s13), 1 }
   0xe   : > { %s311_s22 = sshll.u32 %s418_s13, 3 }
   0xf   : > { %s161_s25 = scalar_lea.vmem %s413_s0, %s311_s22  ;;  %s165_s30 = scalar_lea.vmem %s416_s3, %s311_s22 }
  0x10   : > { %v166_v8 = vld [vmem:[%s161_s25] sm:$0xff] }
  0x11   : > { %331 = vmatmul.mubr.msk.f32.vlgmr.msra.gmra.mrb[0].mxu0 %vm178_vm1, %v166_v8 }
  0xe4   : > { %v248_v10 = vpop.f32.mrb[0].mxu0 }
  0xe5   : > { %v249_v11 = vadd.f32 %v313_v9, %v248_v10  ;;  %v332_v12 = vpop.f32.mrb[1].mxu0 }
  0xe7   : > { %252 = vst [vmem:[%s165_s30] sm:$0xff] %v249_v11 }
  0xe8 PF: > { %s13_s12 = sadd.s32 1, %s356_s12  }
  0xe9   : > { %p10_p4 = scmp.ge.s32.totalorder %s13_s12, 4  }
  0xeb   :  { %12 = sbr.rel (!%p10_p4) target bundleno = 1 (0x1), region = 62 }

</bundles_post_ra>
